<compile_context>
chip_gen: v5e
topology: v5e:2x2
jax: 0.10.0
libtpu: 0.0.40
codegen_flags: <defaults>
</compile_context>

<pallas_src>
import numpy as np
import jax
import jax.numpy as jnp
from jax import lax
from jax.experimental import pallas as pl
from jax.experimental.pallas import tpu as pltpu

# ---- configuration (mirrors DuelingQNetwork __init__ arguments) ----
INPUT_SHAPE = (4, 16, 8)          # (channels, history_len, width)
ACTION_DIM = 5
CNN_MAPS = [8, 16]
CNN_KERNELS = [4, 3]
CNN_STRIDES = [2, 1]
DENSE_VAL = [32]
DENSE_ADV = [32]
ADDITIONAL_FEATS = 6
# dropout_p = 0.1 -> identity in eval mode

C, H, W = INPUT_SHAPE
C1, C2 = CNN_MAPS
K1, K2 = CNN_KERNELS
S1, S2 = CNN_STRIDES
H1 = (H - K1) // S1 + 1            # 7
H2 = (H1 - K2) // S2 + 1           # 5
HIST_FLAT = C * H * W              # 512 (lane-aligned: 4 * 128)
STATE_DIM = HIST_FLAT + ADDITIONAL_FEATS   # 518
N1 = H1 * C1                       # 56  conv1 output (flattened, (h, c) order)
FLAT_CNN = C2 * H2                 # 80  conv2 output in torch flatten order
MLP_IN = FLAT_CNN + ADDITIONAL_FEATS
DV = DENSE_VAL[0]
DA = DENSE_ADV[0]
DHID = DV + DA                     # 64 fused hidden width
OUT_PAD = 8                        # Q output padded to 8 lanes (sliced to 5)


def dueling_q_kernel(state_ref, w1_ref, b1_ref, w2_ref, b2_ref,
                     wd1f_ref, wd1e_ref, bd1_ref, wq_ref, bq_ref, out_ref):
    state = state_ref[...]
    hist = state[:, :HIST_FLAT]          # (TB, 512) lane-aligned static slice
    extra = state[:, HIST_FLAT:]         # (TB, 6)

    # conv1 (+ReLU) as a single banded matmul
    h1 = jnp.maximum(
        jnp.dot(hist, w1_ref[...], preferred_element_type=jnp.float32)
        + b1_ref[...], 0.0)                                        # (TB, 56)

    # conv2 (+ReLU) as a single banded matmul; output already torch-flat order
    h2 = jnp.maximum(
        jnp.dot(h1, w2_ref[...], preferred_element_type=jnp.float32)
        + b2_ref[...], 0.0)                                        # (TB, 80)

    # fused value|advantage hidden layer; split contraction avoids lane concat
    hd = jnp.maximum(
        jnp.dot(h2, wd1f_ref[...], preferred_element_type=jnp.float32)
        + jnp.dot(extra, wd1e_ref[...], preferred_element_type=jnp.float32)
        + bd1_ref[...], 0.0)                                       # (TB, 64)

    # final dot: dueling combine folded into wq/bq -> Q-values directly
    q = jnp.dot(hd, wq_ref[...], preferred_element_type=jnp.float32) + bq_ref[...]
    out_ref[...] = q.astype(out_ref.dtype)                         # (TB, 8)


def prepare_params(params):
    """One-time param prep: build banded conv weights + fused dense weights."""
    f32 = jnp.float32
    W1 = params["W1"].astype(f32)        # (C1, C, K1, W)
    W2 = params["W2"].astype(f32)        # (C2, C1, K2, 1)

    # conv1 banded weight: (C*H*W, H1*C1); column h*C1 + c1
    w1b = jnp.zeros((HIST_FLAT, N1), f32)
    w1_flat = W1.reshape(C1, C * K1 * W).T            # (C*K1*W, C1), (c,kh,w) rows
    for hpos in range(H1):
        rows = (np.arange(C)[:, None, None] * H * W
                + (hpos * S1 + np.arange(K1))[None, :, None] * W
                + np.arange(W)[None, None, :]).reshape(-1)
        cols = np.arange(hpos * C1, (hpos + 1) * C1)
        w1b = w1b.at[rows[:, None], cols[None, :]].set(w1_flat)
    b1b = jnp.tile(params["b1"].astype(f32), H1).reshape(1, N1)

    # conv2 banded weight: (H1*C1, C2*H2); output column c2*H2 + h2 (torch order)
    w2b = jnp.zeros((N1, FLAT_CNN), f32)
    for hpos in range(H2):
        cols = np.arange(C2) * H2 + hpos
        for kh in range(K2):
            r0 = (hpos * S2 + kh) * C1
            rows = np.arange(r0, r0 + C1)
            w2b = w2b.at[rows[:, None], cols[None, :]].set(W2[:, :, kh, 0].T)
    b2b = jnp.repeat(params["b2"].astype(f32), H2).reshape(1, FLAT_CNN)

    # fused first dense layer of both streams, split into feat / extra parts
    wd1 = jnp.concatenate([params["Wv1"].T, params["Wa1"].T], axis=1).astype(f32)
    wd1f = wd1[:FLAT_CNN]                # (80, 64)
    wd1e = wd1[FLAT_CNN:]                # (6, 64)
    bd1 = jnp.concatenate([params["bv1"], params["ba1"]]).astype(f32).reshape(1, DHID)

    # final weight with the dueling combine folded in, lane-padded to OUT_PAD
    wv2 = params["Wv2"].astype(f32)      # (1, DV)
    wa2 = params["Wa2"].astype(f32)      # (A, DA)
    bv2 = params["bv2"].astype(f32)
    ba2 = params["ba2"].astype(f32)
    wq = jnp.zeros((DHID, OUT_PAD), f32)
    wq = wq.at[:DV, :ACTION_DIM].set(
        jnp.broadcast_to(wv2[0][:, None], (DV, ACTION_DIM)))
    wq = wq.at[DV:, :ACTION_DIM].set((wa2 - wa2.mean(axis=0, keepdims=True)).T)
    bq = jnp.zeros((1, OUT_PAD), f32)
    bq = bq.at[0, :ACTION_DIM].set(bv2[0] + ba2 - ba2.mean())

    return {"w1b": w1b, "b1b": b1b, "w2b": w2b, "b2b": b2b,
            "wd1f": wd1f, "wd1e": wd1e, "bd1": bd1, "wq": wq, "bq": bq}


def _round_up(x, m):
    return (x + m - 1) // m * m


@jax.jit
def dueling_q_forward(state, prep):
    B = state.shape[0]
    TB = min(512, _round_up(B, 8))               # batch tile (sublane-aligned)
    B_pad = _round_up(B, TB)
    if B_pad != B:
        state = jnp.pad(state, ((0, B_pad - B), (0, 0)))
    n_tiles = B_pad // TB

    batch_spec = pl.BlockSpec((TB, STATE_DIM), lambda i: (i, 0))
    out_spec = pl.BlockSpec((TB, OUT_PAD), lambda i: (i, 0))

    def resident(shape):
        # constant index_map -> weights stay VMEM-resident across batch tiles
        return pl.BlockSpec(shape, lambda i: (0, 0))

    out = pl.pallas_call(
        dueling_q_kernel,
        out_shape=jax.ShapeDtypeStruct((B_pad, OUT_PAD), jnp.float32),
        grid=(n_tiles,),
        in_specs=[batch_spec,
                  resident((HIST_FLAT, N1)), resident((1, N1)),
                  resident((N1, FLAT_CNN)), resident((1, FLAT_CNN)),
                  resident((FLAT_CNN, DHID)),
                  resident((ADDITIONAL_FEATS, DHID)),
                  resident((1, DHID)),
                  resident((DHID, OUT_PAD)), resident((1, OUT_PAD))],
        out_specs=out_spec,
        compiler_params=pltpu.CompilerParams(
            dimension_semantics=("parallel",)),
    )(state, prep["w1b"], prep["b1b"], prep["w2b"], prep["b2b"],
      prep["wd1f"], prep["wd1e"], prep["bd1"], prep["wq"], prep["bq"])

    return out[:B, :ACTION_DIM]


def init_params(key):
    """Deterministic PyTorch-default-like uniform(-1/sqrt(fan_in), +) init."""
    ks = jax.random.split(key, 12)

    def u(k, shape, fan_in):
        bound = 1.0 / np.sqrt(fan_in)
        return jax.random.uniform(k, shape, jnp.float32, -bound, bound)

    return {
        "W1": u(ks[0], (C1, C, K1, W), C * K1 * W),
        "b1": u(ks[1], (C1,), C * K1 * W),
        "W2": u(ks[2], (C2, C1, K2, 1), C1 * K2),
        "b2": u(ks[3], (C2,), C1 * K2),
        "Wv1": u(ks[4], (DV, MLP_IN), MLP_IN),
        "bv1": u(ks[5], (DV,), MLP_IN),
        "Wv2": u(ks[6], (1, DV), DV),
        "bv2": u(ks[7], (1,), DV),
        "Wa1": u(ks[8], (DA, MLP_IN), MLP_IN),
        "ba1": u(ks[9], (DA,), MLP_IN),
        "Wa2": u(ks[10], (ACTION_DIM, DA), DA),
        "ba2": u(ks[11], (ACTION_DIM,), DA),
    }


def reference_forward(state, params):
    """Pure-JAX reference (eval mode), mirrors the PyTorch forward exactly."""
    B = state.shape[0]
    hist = state[:, :HIST_FLAT].reshape(B, C, H, W)
    extra = state[:, HIST_FLAT:]
    dn = ("NCHW", "OIHW", "NCHW")
    x = lax.conv_general_dilated(hist, params["W1"], (S1, 1), "VALID",
                                 dimension_numbers=dn)
    x = jnp.maximum(x + params["b1"].reshape(1, C1, 1, 1), 0.0)
    x = lax.conv_general_dilated(x, params["W2"], (S2, 1), "VALID",
                                 dimension_numbers=dn)
    x = jnp.maximum(x + params["b2"].reshape(1, C2, 1, 1), 0.0)
    comb = jnp.concatenate([x.reshape(B, -1), extra], axis=1)
    hv = jnp.maximum(comb @ params["Wv1"].T + params["bv1"], 0.0)
    v = hv @ params["Wv2"].T + params["bv2"]
    ha = jnp.maximum(comb @ params["Wa1"].T + params["ba1"], 0.0)
    a = ha @ params["Wa2"].T + params["ba2"]
    return v + (a - a.mean(axis=1, keepdims=True))


if __name__ == "__main__":
    key = jax.random.PRNGKey(0)
    pkey, skey = jax.random.split(key)
    params = init_params(pkey)
    prep = prepare_params(params)          # one-time weight prep

    B = 2
    state = jax.random.normal(skey, (B, STATE_DIM), jnp.float32)

    q = dueling_q_forward(state, prep)
    q = jax.block_until_ready(q)

    q_ref = reference_forward(state, params)
    np.testing.assert_allclose(np.asarray(q), np.asarray(q_ref),
                               rtol=1e-4, atol=1e-4)
    print("KERNEL_OK")
</pallas_src>

<mosaic_0001>
module attributes {stable_mosaic.version = 11 : i64} {
  func.func @dueling_q_kernel(%arg0: i32, %arg1: memref<8x518xf32, #tpu.memory_space<vmem>>, %arg2: memref<512x56xf32, #tpu.memory_space<vmem>>, %arg3: memref<1x56xf32, #tpu.memory_space<vmem>>, %arg4: memref<56x80xf32, #tpu.memory_space<vmem>>, %arg5: memref<1x80xf32, #tpu.memory_space<vmem>>, %arg6: memref<80x64xf32, #tpu.memory_space<vmem>>, %arg7: memref<6x64xf32, #tpu.memory_space<vmem>>, %arg8: memref<1x64xf32, #tpu.memory_space<vmem>>, %arg9: memref<64x8xf32, #tpu.memory_space<vmem>>, %arg10: memref<1x8xf32, #tpu.memory_space<vmem>>, %arg11: memref<8x8xf32, #tpu.memory_space<vmem>>) attributes {dimension_semantics = [#tpu.dimension_semantics<parallel>], iteration_bounds = array<i64: 1>, scalar_prefetch = 0 : i64, scratch_operands = 0 : i64, tpu.core_type = #tpu.core_type<tc>, window_params = [{transform_indices = @transform_0, window_bounds = array<i64: 8, 518>}, {pipeline_mode = #tpu.pipeline_mode<synchronous>, transform_indices = @transform_1, window_bounds = array<i64: 512, 56>}, {pipeline_mode = #tpu.pipeline_mode<synchronous>, transform_indices = @transform_2, window_bounds = array<i64: 1, 56>}, {pipeline_mode = #tpu.pipeline_mode<synchronous>, transform_indices = @transform_3, window_bounds = array<i64: 56, 80>}, {pipeline_mode = #tpu.pipeline_mode<synchronous>, transform_indices = @transform_4, window_bounds = array<i64: 1, 80>}, {pipeline_mode = #tpu.pipeline_mode<synchronous>, transform_indices = @transform_5, window_bounds = array<i64: 80, 64>}, {pipeline_mode = #tpu.pipeline_mode<synchronous>, transform_indices = @transform_6, window_bounds = array<i64: 6, 64>}, {pipeline_mode = #tpu.pipeline_mode<synchronous>, transform_indices = @transform_7, window_bounds = array<i64: 1, 64>}, {pipeline_mode = #tpu.pipeline_mode<synchronous>, transform_indices = @transform_8, window_bounds = array<i64: 64, 8>}, {pipeline_mode = #tpu.pipeline_mode<synchronous>, transform_indices = @transform_9, window_bounds = array<i64: 1, 8>}, {transform_indices = @transform_10, window_bounds = array<i64: 8, 8>}]} {
    %c0 = arith.constant 0 : index
    %c0_0 = arith.constant 0 : index
    %0 = vector.load %arg1[%c0, %c0_0] : memref<8x518xf32, #tpu.memory_space<vmem>>, vector<8x518xf32>
    %1 = vector.extract_strided_slice %0 {offsets = [0, 0], sizes = [8, 512], strides = [1, 1]} : vector<8x518xf32> to vector<8x512xf32>
    %2 = vector.extract_strided_slice %0 {offsets = [0, 512], sizes = [8, 6], strides = [1, 1]} : vector<8x518xf32> to vector<8x6xf32>
    %c0_1 = arith.constant 0 : index
    %c0_2 = arith.constant 0 : index
    %3 = vector.load %arg2[%c0_1, %c0_2] : memref<512x56xf32, #tpu.memory_space<vmem>>, vector<512x56xf32>
    %cst = arith.constant dense<0.000000e+00> : vector<8x56xf32>
    %4 = tpu.matmul %1, %3, %cst {dimension_numbers = #tpu.dot_dimension_numbers<[1], [0], [0], [1], [0, 0, 1, 1], [], []>} : vector<8x512xf32>, vector<512x56xf32>, vector<8x56xf32> -> vector<8x56xf32>
    %c0_3 = arith.constant 0 : index
    %c0_4 = arith.constant 0 : index
    %5 = vector.load %arg3[%c0_3, %c0_4] : memref<1x56xf32, #tpu.memory_space<vmem>>, vector<1x56xf32>
    %6 = vector.broadcast %5 : vector<1x56xf32> to vector<8x56xf32>
    %7 = arith.addf %4, %6 : vector<8x56xf32>
    %cst_5 = arith.constant 0.000000e+00 : f32
    %8 = vector.broadcast %cst_5 : f32 to vector<8x56xf32>
    %9 = arith.maximumf %7, %8 : vector<8x56xf32>
    %c0_6 = arith.constant 0 : index
    %c0_7 = arith.constant 0 : index
    %10 = vector.load %arg4[%c0_6, %c0_7] : memref<56x80xf32, #tpu.memory_space<vmem>>, vector<56x80xf32>
    %cst_8 = arith.constant dense<0.000000e+00> : vector<8x80xf32>
    %11 = tpu.matmul %9, %10, %cst_8 {dimension_numbers = #tpu.dot_dimension_numbers<[1], [0], [0], [1], [0, 0, 1, 1], [], []>} : vector<8x56xf32>, vector<56x80xf32>, vector<8x80xf32> -> vector<8x80xf32>
    %c0_9 = arith.constant 0 : index
    %c0_10 = arith.constant 0 : index
    %12 = vector.load %arg5[%c0_9, %c0_10] : memref<1x80xf32, #tpu.memory_space<vmem>>, vector<1x80xf32>
    %13 = vector.broadcast %12 : vector<1x80xf32> to vector<8x80xf32>
    %14 = arith.addf %11, %13 : vector<8x80xf32>
    %cst_11 = arith.constant 0.000000e+00 : f32
    %15 = vector.broadcast %cst_11 : f32 to vector<8x80xf32>
    %16 = arith.maximumf %14, %15 : vector<8x80xf32>
    %c0_12 = arith.constant 0 : index
    %c0_13 = arith.constant 0 : index
    %17 = vector.load %arg6[%c0_12, %c0_13] : memref<80x64xf32, #tpu.memory_space<vmem>>, vector<80x64xf32>
    %cst_14 = arith.constant dense<0.000000e+00> : vector<8x64xf32>
    %18 = tpu.matmul %16, %17, %cst_14 {dimension_numbers = #tpu.dot_dimension_numbers<[1], [0], [0], [1], [0, 0, 1, 1], [], []>} : vector<8x80xf32>, vector<80x64xf32>, vector<8x64xf32> -> vector<8x64xf32>
    %c0_15 = arith.constant 0 : index
    %c0_16 = arith.constant 0 : index
    %19 = vector.load %arg7[%c0_15, %c0_16] : memref<6x64xf32, #tpu.memory_space<vmem>>, vector<6x64xf32>
    %cst_17 = arith.constant dense<0.000000e+00> : vector<8x64xf32>
    %20 = tpu.matmul %2, %19, %cst_17 {dimension_numbers = #tpu.dot_dimension_numbers<[1], [0], [0], [1], [0, 0, 1, 1], [], []>} : vector<8x6xf32>, vector<6x64xf32>, vector<8x64xf32> -> vector<8x64xf32>
    %21 = arith.addf %18, %20 : vector<8x64xf32>
    %c0_18 = arith.constant 0 : index
    %c0_19 = arith.constant 0 : index
    %22 = vector.load %arg8[%c0_18, %c0_19] : memref<1x64xf32, #tpu.memory_space<vmem>>, vector<1x64xf32>
    %23 = vector.broadcast %22 : vector<1x64xf32> to vector<8x64xf32>
    %24 = arith.addf %21, %23 : vector<8x64xf32>
    %cst_20 = arith.constant 0.000000e+00 : f32
    %25 = vector.broadcast %cst_20 : f32 to vector<8x64xf32>
    %26 = arith.maximumf %24, %25 : vector<8x64xf32>
    %c0_21 = arith.constant 0 : index
    %c0_22 = arith.constant 0 : index
    %27 = vector.load %arg9[%c0_21, %c0_22] : memref<64x8xf32, #tpu.memory_space<vmem>>, vector<64x8xf32>
    %cst_23 = arith.constant dense<0.000000e+00> : vector<8x8xf32>
    %28 = tpu.matmul %26, %27, %cst_23 {dimension_numbers = #tpu.dot_dimension_numbers<[1], [0], [0], [1], [0, 0, 1, 1], [], []>} : vector<8x64xf32>, vector<64x8xf32>, vector<8x8xf32> -> vector<8x8xf32>
    %c0_24 = arith.constant 0 : index
    %c0_25 = arith.constant 0 : index
    %29 = vector.load %arg10[%c0_24, %c0_25] : memref<1x8xf32, #tpu.memory_space<vmem>>, vector<1x8xf32>
    %30 = vector.broadcast %29 : vector<1x8xf32> to vector<8x8xf32>
    %31 = arith.addf %28, %30 : vector<8x8xf32>
    %c0_26 = arith.constant 0 : index
    %c0_27 = arith.constant 0 : index
    %32 = vector.load %arg11[%c0_26, %c0_27] : memref<8x8xf32, #tpu.memory_space<vmem>>, vector<8x8xf32>
    tpu.vector_store %arg11[%c0_26, %c0_27], %31 {strides = array<i32>} : memref<8x8xf32, #tpu.memory_space<vmem>>, vector<8x8xf32>,
    return
  }
  func.func @transform_0(%arg0: i32) -> (i32, i32) {
    %c0_i32 = arith.constant 0 : i32
    %c0_i32_0 = arith.constant 0 : i32
    return %arg0, %c0_i32 : i32, i32
  }
  func.func @transform_1(%arg0: i32) -> (i32, i32) {
    %c0_i32 = arith.constant 0 : i32
    %c0_i32_0 = arith.constant 0 : i32
    %c0_i32_1 = arith.constant 0 : i32
    return %c0_i32, %c0_i32_0 : i32, i32
  }
  func.func @transform_2(%arg0: i32) -> (i32, i32) {
    %c0_i32 = arith.constant 0 : i32
    %c0_i32_0 = arith.constant 0 : i32
    %c0_i32_1 = arith.constant 0 : i32
    return %c0_i32, %c0_i32_0 : i32, i32
  }
  func.func @transform_3(%arg0: i32) -> (i32, i32) {
    %c0_i32 = arith.constant 0 : i32
    %c0_i32_0 = arith.constant 0 : i32
    %c0_i32_1 = arith.constant 0 : i32
    return %c0_i32, %c0_i32_0 : i32, i32
  }
  func.func @transform_4(%arg0: i32) -> (i32, i32) {
    %c0_i32 = arith.constant 0 : i32
    %c0_i32_0 = arith.constant 0 : i32
    %c0_i32_1 = arith.constant 0 : i32
    return %c0_i32, %c0_i32_0 : i32, i32
  }
  func.func @transform_5(%arg0: i32) -> (i32, i32) {
    %c0_i32 = arith.constant 0 : i32
    %c0_i32_0 = arith.constant 0 : i32
    %c0_i32_1 = arith.constant 0 : i32
    return %c0_i32, %c0_i32_0 : i32, i32
  }
  func.func @transform_6(%arg0: i32) -> (i32, i32) {
    %c0_i32 = arith.constant 0 : i32
    %c0_i32_0 = arith.constant 0 : i32
    %c0_i32_1 = arith.constant 0 : i32
    return %c0_i32, %c0_i32_0 : i32, i32
  }
  func.func @transform_7(%arg0: i32) -> (i32, i32) {
    %c0_i32 = arith.constant 0 : i32
    %c0_i32_0 = arith.constant 0 : i32
    %c0_i32_1 = arith.constant 0 : i32
    return %c0_i32, %c0_i32_0 : i32, i32
  }
  func.func @transform_8(%arg0: i32) -> (i32, i32) {
    %c0_i32 = arith.constant 0 : i32
    %c0_i32_0 = arith.constant 0 : i32
    %c0_i32_1 = arith.constant 0 : i32
    return %c0_i32, %c0_i32_0 : i32, i32
  }
  func.func @transform_9(%arg0: i32) -> (i32, i32) {
    %c0_i32 = arith.constant 0 : i32
    %c0_i32_0 = arith.constant 0 : i32
    %c0_i32_1 = arith.constant 0 : i32
    return %c0_i32, %c0_i32_0 : i32, i32
  }
  func.func @transform_10(%arg0: i32) -> (i32, i32) {
    %c0_i32 = arith.constant 0 : i32
    %c0_i32_0 = arith.constant 0 : i32
    return %arg0, %c0_i32 : i32, i32
  }
}

</mosaic_0001>

<bundles_post_ra>
// kernel: dueling_q_forward.1
= control target key start
LH: loop header
LB: loop body
LE: loop exit
PB: predicated region body
PF: predicated region fallthrough
CT: control target
= control target key end

     0   :  { %vm200_vm0 = vcmask 457728   ;;  %vm240_vm1 = vcmask 1045504   ;;  %vm236_vm2 = vcmask 48128   ;;  %vm264_vm3 = vcmask 654336   ;;  %s700_s1 = inlined_call_operand.vmem [shape: f32[512,56], index: 1, kind: input, shape index: {}]   ;;  %s701_s2 = inlined_call_operand.vmem [shape: f32[1,56], index: 2, kind: input, shape index: {}]   ;;  %s702_s0 = inlined_call_operand.vmem [shape: f32[8,518], index: 0, kind: input, shape index: {}]   ;;  %s703_s3 = inlined_call_operand.vmem [shape: f32[56,80], index: 3, kind: input, shape index: {}]   ;;  %s704_s4 = inlined_call_operand.vmem [shape: f32[1,80], index: 4, kind: input, shape index: {}]   ;;  %s705_s5 = inlined_call_operand.vmem [shape: f32[80,64], index: 5, kind: input, shape index: {}]   ;;  %s706_s6 = inlined_call_operand.vmem [shape: f32[6,64], index: 6, kind: input, shape index: {}]   ;;  %s707_s8 = inlined_call_operand.vmem [shape: f32[64,8], index: 8, kind: input, shape index: {}]   ;;  %s708_s7 = inlined_call_operand.vmem [shape: f32[1,64], index: 7, kind: input, shape index: {}]   ;;  %s709_s9 = inlined_call_operand.vmem [shape: f32[1,8], index: 9, kind: input, shape index: {}]   ;;  %s710_s10 = inlined_call_operand.vmem [shape: f32[8,8], index: 10, kind: output, shape index: {}]  }
   0x1   :  { %v87_v0 = vld [vmem:[%s700_s1 + $0x178] sm:$0xff]  ;;  %v86_v2 = vld [vmem:[%s700_s1 + $0x170] sm:$0xff]  ;;  %v85_v6 = vld [vmem:[%s700_s1 + $0x168] sm:$0xff]  ;;  %vm306_vm4 = vcmask 523264   ;;  %vm330_vm5 = vcmask 64512  }
   0x2   :  { %v55_v1 = vld [vmem:[%s700_s1 + $0x78] sm:$0xff]  ;;  %148 = vmatpush.msra.mxu2 %v87_v0  ;;  %v54_v4 = vld [vmem:[%s700_s1 + $0x70] sm:$0xff]  ;;  %v53_v8 = vld [vmem:[%s700_s1 + $0x68] sm:$0xff] }
   0x3   :  { %108 = vmatpush.msra.mxu0 %v55_v1  ;;  %v103_v3 = vld [vmem:[%s700_s1 + $0x1f8] sm:$0xff]  ;;  %v102_v7 = vld [vmem:[%s700_s1 + $0x1f0] sm:$0xff]  ;;  %v101_v10 = vld [vmem:[%s700_s1 + $0x1e8] sm:$0xff] }
   0x4   :  { %v71_v5 = vld [vmem:[%s700_s1 + $0xf8] sm:$0xff]  ;;  %168 = vmatpush.msra.mxu3 %v103_v3  ;;  %149 = vmatpush.msra.mxu2 %v86_v2  ;;  %v70_v9 = vld [vmem:[%s700_s1 + $0xf0] sm:$0xff]  ;;  %v84_v11 = vld [vmem:[%s700_s1 + $0x160] sm:$0xff] }
   0x5   :  { %128 = vmatpush.msra.mxu1 %v71_v5  ;;  %109 = vmatpush.msra.mxu0 %v54_v4  ;;  %v52_v12 = vld [vmem:[%s700_s1 + $0x60] sm:$0xff]  ;;  %v69_v13 = vld [vmem:[%s700_s1 + $0xe8] sm:$0xff]  ;;  %v83_v16 = vld [vmem:[%s700_s1 + $0x158] sm:$0xff] }
   0x6   :  { %169 = vmatpush.msra.mxu3 %v102_v7  ;;  %150 = vmatpush.msra.mxu2 %v85_v6  ;;  %v100_v14 = vld [vmem:[%s700_s1 + $0x1e0] sm:$0xff]  ;;  %v51_v17 = vld [vmem:[%s700_s1 + $0x58] sm:$0xff]  ;;  %v82_v20 = vld [vmem:[%s700_s1 + $0x150] sm:$0xff] }
   0x7   :  { %129 = vmatpush.msra.mxu1 %v70_v9  ;;  %110 = vmatpush.msra.mxu0 %v53_v8  ;;  %v68_v15 = vld [vmem:[%s700_s1 + $0xe0] sm:$0xff]  ;;  %v99_v18 = vld [vmem:[%s700_s1 + $0x1d8] sm:$0xff]  ;;  %v50_v21 = vld [vmem:[%s700_s1 + $0x50] sm:$0xff] }
   0x8   :  { %170 = vmatpush.msra.mxu3 %v101_v10  ;;  %151 = vmatpush.msra.mxu2 %v84_v11  ;;  %v67_v19 = vld [vmem:[%s700_s1 + $0xd8] sm:$0xff]  ;;  %v98_v22 = vld [vmem:[%s700_s1 + $0x1d0] sm:$0xff]  ;;  %v81_v24 = vld [vmem:[%s700_s1 + $0x148] sm:$0xff] }
   0x9   :  { %130 = vmatpush.msra.mxu1 %v69_v13  ;;  %111 = vmatpush.msra.mxu0 %v52_v12  ;;  %v66_v23 = vld [vmem:[%s700_s1 + $0xd0] sm:$0xff]  ;;  %v49_v25 = vld [vmem:[%s700_s1 + $0x48] sm:$0xff]  ;;  %v80_v28 = vld [vmem:[%s700_s1 + $0x140] sm:$0xff] }
   0xa   :  { %171 = vmatpush.msra.mxu3 %v100_v14  ;;  %152 = vmatpush.msra.mxu2 %v83_v16  ;;  %v97_v26 = vld [vmem:[%s700_s1 + $0x1c8] sm:$0xff]  ;;  %v48_v29 = vld [vmem:[%s700_s1 + $0x40] sm:$0xff]  ;;  %v79_v32 = vld [vmem:[%s700_s1 + $0x138] sm:$0xff] }
   0xb   :  { %131 = vmatpush.msra.mxu1 %v68_v15  ;;  %112 = vmatpush.msra.mxu0 %v51_v17  ;;  %v65_v27 = vld [vmem:[%s700_s1 + $0xc8] sm:$0xff]  ;;  %v96_v30 = vld [vmem:[%s700_s1 + $0x1c0] sm:$0xff]  ;;  %v47_v33 = vld [vmem:[%s700_s1 + $0x38] sm:$0xff] }
   0xc   :  { %172 = vmatpush.msra.mxu3 %v99_v18  ;;  %153 = vmatpush.msra.mxu2 %v82_v20  ;;  %v64_v31 = vld [vmem:[%s700_s1 + $0xc0] sm:$0xff]  ;;  %v95_v34 = vld [vmem:[%s700_s1 + $0x1b8] sm:$0xff]  ;;  %v78_v36 = vld [vmem:[%s700_s1 + $0x130] sm:$0xff] }
   0xd   :  { %132 = vmatpush.msra.mxu1 %v67_v19  ;;  %113 = vmatpush.msra.mxu0 %v50_v21  ;;  %v63_v35 = vld [vmem:[%s700_s1 + $0xb8] sm:$0xff]  ;;  %v46_v37 = vld [vmem:[%s700_s1 + $0x30] sm:$0xff]  ;;  %v77_v40 = vld [vmem:[%s700_s1 + $0x128] sm:$0xff] }
   0xe   :  { %173 = vmatpush.msra.mxu3 %v98_v22  ;;  %154 = vmatpush.msra.mxu2 %v81_v24  ;;  %v94_v38 = vld [vmem:[%s700_s1 + $0x1b0] sm:$0xff]  ;;  %v45_v41 = vld [vmem:[%s700_s1 + $0x28] sm:$0xff]  ;;  %v76_v44 = vld [vmem:[%s700_s1 + $0x120] sm:$0xff] }
   0xf   :  { %133 = vmatpush.msra.mxu1 %v66_v23  ;;  %114 = vmatpush.msra.mxu0 %v49_v25  ;;  %v62_v39 = vld [vmem:[%s700_s1 + $0xb0] sm:$0xff]  ;;  %v93_v42 = vld [vmem:[%s700_s1 + $0x1a8] sm:$0xff]  ;;  %v44_v45 = vld [vmem:[%s700_s1 + $0x20] sm:$0xff] }
  0x10   :  { %174 = vmatpush.msra.mxu3 %v97_v26  ;;  %155 = vmatpush.msra.mxu2 %v80_v28  ;;  %v61_v43 = vld [vmem:[%s700_s1 + $0xa8] sm:$0xff]  ;;  %v92_v46 = vld [vmem:[%s700_s1 + $0x1a0] sm:$0xff]  ;;  %v75_v48 = vld [vmem:[%s700_s1 + $0x118] sm:$0xff] }
  0x11   :  { %134 = vmatpush.msra.mxu1 %v65_v27  ;;  %115 = vmatpush.msra.mxu0 %v48_v29  ;;  %v60_v47 = vld [vmem:[%s700_s1 + $0xa0] sm:$0xff]  ;;  %v43_v49 = vld [vmem:[%s700_s1 + $0x18] sm:$0xff]  ;;  %v74_v52 = vld [vmem:[%s700_s1 + $0x110] sm:$0xff] }
  0x12   :  { %175 = vmatpush.msra.mxu3 %v96_v30  ;;  %156 = vmatpush.msra.mxu2 %v79_v32  ;;  %v91_v50 = vld [vmem:[%s700_s1 + $0x198] sm:$0xff]  ;;  %v42_v53 = vld [vmem:[%s700_s1 + $0x10] sm:$0xff]  ;;  %v73_v56 = vld [vmem:[%s700_s1 + $0x108] sm:$0xff] }
  0x13   :  { %135 = vmatpush.msra.mxu1 %v64_v31  ;;  %116 = vmatpush.msra.mxu0 %v47_v33  ;;  %v59_v51 = vld [vmem:[%s700_s1 + $0x98] sm:$0xff]  ;;  %v90_v54 = vld [vmem:[%s700_s1 + $0x190] sm:$0xff]  ;;  %v41_v57 = vld [vmem:[%s700_s1 + $0x8] sm:$0xff] }
  0x14   :  { %176 = vmatpush.msra.mxu3 %v95_v34  ;;  %157 = vmatpush.msra.mxu2 %v78_v36  ;;  %v58_v55 = vld [vmem:[%s700_s1 + $0x90] sm:$0xff]  ;;  %v89_v58 = vld [vmem:[%s700_s1 + $0x188] sm:$0xff]  ;;  %v72_v60 = vld [vmem:[%s700_s1 + $0x100] sm:$0xff] }
  0x15   :  { %136 = vmatpush.msra.mxu1 %v63_v35  ;;  %117 = vmatpush.msra.mxu0 %v46_v37  ;;  %v57_v59 = vld [vmem:[%s700_s1 + $0x88] sm:$0xff]  ;;  %v40_v61 = vld [vmem:[%s700_s1] sm:$0xff]  ;;  %v37_v62 = vld [vmem:[%s702_s0 + $0x10] sm:$0xff] }
  0x16   :  { %177 = vmatpush.msra.mxu3 %v94_v38  ;;  %158 = vmatpush.msra.mxu2 %v77_v40  ;;  %v88_v63 = vld [vmem:[%s700_s1 + $0x180] sm:$0xff]  ;;  %v38_v1 = vld [vmem:[%s702_s0 + $0x18] sm:$0xff]  ;;  %v195_v3 = vld [vmem:[%s703_s3 + $0x30] sm:$0xff] }
  0x17   :  { %137 = vmatpush.msra.mxu1 %v62_v39  ;;  %118 = vmatpush.msra.mxu0 %v45_v41  ;;  %v35_v0 = vld [vmem:[%s702_s0] sm:$0xff]  ;;  %v36_v4 = vld [vmem:[%s702_s0 + $0x8] sm:$0xff]  ;;  %v192_v7 = vld [vmem:[%s703_s3 + $0x18] sm:$0xff] }
  0x18   :  { %178 = vmatpush.msra.mxu3 %v93_v42  ;;  %159 = vmatpush.msra.mxu2 %v76_v44  ;;  %v56_v2 = vld [vmem:[%s700_s1 + $0x80] sm:$0xff]  ;;  %v194_v5 = vld [vmem:[%s703_s3 + $0x28] sm:$0xff]  ;;  %v191_v8 = vld [vmem:[%s703_s3 + $0x10] sm:$0xff] }
  0x19   :  { %138 = vmatpush.msra.mxu1 %v61_v43  ;;  %119 = vmatpush.msra.mxu0 %v44_v45  ;;  %v193_v6 = vld [vmem:[%s703_s3 + $0x20] sm:$0xff]  ;;  %v190_v9 = vld [vmem:[%s703_s3 + $0x8] sm:$0xff]  ;;  %v232_v13 = vld [vmem:[%s705_s5 + $0x38] sm:$0xff] }
  0x1a   :  { %179 = vmatpush.msra.mxu3 %v92_v46  ;;  %160 = vmatpush.msra.mxu2 %v75_v48  ;;  %v189_v10 = vld [vmem:[%s703_s3] sm:$0xff]  ;;  %v234_v11 = vld [vmem:[%s705_s5 + $0x48] sm:$0xff]  ;;  %v231_v14 = vld [vmem:[%s705_s5 + $0x30] sm:$0xff] }
  0x1b   :  { %139 = vmatpush.msra.mxu1 %v60_v47  ;;  %120 = vmatpush.msra.mxu0 %v43_v49  ;;  %v233_v12 = vld [vmem:[%s705_s5 + $0x40] sm:$0xff]  ;;  %v230_v15 = vld [vmem:[%s705_s5 + $0x28] sm:$0xff]  ;;  %v228_v17 = vld [vmem:[%s705_s5 + $0x18] sm:$0xff] }
  0x1c   :  { %180 = vmatpush.msra.mxu3 %v91_v50  ;;  %161 = vmatpush.msra.mxu2 %v74_v52  ;;  %v229_v16 = vld [vmem:[%s705_s5 + $0x20] sm:$0xff]  ;;  %v227_v28 = vld [vmem:[%s705_s5 + $0x10] sm:$0xff]  ;;  %v226_v29 = vld [vmem:[%s705_s5 + $0x8] sm:$0xff] }
  0x1d   :  { %140 = vmatpush.msra.mxu1 %v59_v51  ;;  %121 = vmatpush.msra.mxu0 %v42_v53  ;;  %v341_v18 = vld [vmem:[%s701_s2] ss:$0 sm:$0xff]  ;;  %v301_v33 = vld [vmem:[%s707_s8 + $0x38] sm:$0xff]  ;;  %v300_v34 = vld [vmem:[%s707_s8 + $0x30] sm:$0xff] }
  0x1e   :  { %181 = vmatpush.msra.mxu3 %v90_v54  ;;  %162 = vmatpush.msra.mxu2 %v73_v56  ;;  %v235_v30 = vld [vmem:[%s706_s6] sm:$0x3f]  ;;  %v299_v35 = vld [vmem:[%s707_s8 + $0x28] sm:$0xff]  ;;  %v297_v41 = vld [vmem:[%s707_s8 + $0x18] sm:$0xff] }
  0x1f   :  { %141 = vmatpush.msra.mxu1 %v58_v55  ;;  %122 = vmatpush.msra.mxu0 %v41_v57  ;;  %v225_v31 = vld [vmem:[%s705_s5] sm:$0xff]  ;;  %v296_v42 = vld [vmem:[%s707_s8 + $0x10] sm:$0xff]  ;;  %v295_v43 = vld [vmem:[%s707_s8 + $0x8] sm:$0xff] }
  0x20   :  { %182 = vmatpush.msra.mxu3 %v89_v58  ;;  %163 = vmatpush.msra.mxu2 %v72_v60  ;;  %v39_v32 = vld [vmem:[%s702_s0 + $0x20] sm:$0xff] }
  0x21   :  { %142 = vmatpush.msra.mxu1 %v57_v59  ;;  %123 = vmatpush.msra.mxu0 %v40_v61  ;;  %v298_v36 = vld [vmem:[%s707_s8 + $0x20] sm:$0xff] }
  0x22   :  { %164 = vmatmul.f32.vlgmr.msra.gmra.mxu2 %v37_v62  ;;  %183 = vmatpush.msra.mxu3 %v88_v63  ;;  %v342_v37 = vld [vmem:[%s704_s4] ss:$0 sm:$0xff] }
  0x23   :  { %124 = vmatmul.f32.vlgmr.msra.gmra.mxu0 %v35_v0  ;;  %184 = vmatmul.f32.vlgmr.msra.gmra.mxu3 %v38_v1  ;;  %v294_v44 = vld [vmem:[%s707_s8] sm:$0xff] }
  0x24   :  { %143 = vmatpush.msra.mxu1 %v56_v2  ;;  %213 = vmatpush.msrb.mxu0 %v195_v3  ;;  %v343_v46 = vld [vmem:[%s708_s7] ss:$0 sm:$0xff] }
  0x25   :  { %144 = vmatmul.f32.vlgmr.msra.gmra.mxu1 %v36_v4  ;;  %274 = vmatpush.msrb.mxu2 %v234_v11  ;;  %v344_v51 = vld [vmem:[%s709_s9] ss:$0 sm:$0xff] }
  0x26   :  { %214 = vmatpush.msrb.mxu0 %v194_v5  ;;  %337 = vmatpush.msk.msrb.mxu1 %vm240_vm1, %v235_v30 }
  0x27   :  { %275 = vmatpush.msrb.mxu2 %v233_v12  ;;  %318 = vmatpush.msrb.mxu3 %v301_v33 }
  0x28   :  { %215 = vmatpush.msrb.mxu0 %v193_v6 }
  0x29   :  { %276 = vmatpush.msrb.mxu2 %v232_v13  ;;  %319 = vmatpush.msrb.mxu3 %v300_v34 }
  0x2a   :  { %216 = vmatpush.msrb.mxu0 %v192_v7 }
  0x2b   :  { %277 = vmatpush.msrb.mxu2 %v231_v14  ;;  %320 = vmatpush.msrb.mxu3 %v299_v35 }
  0x2c   :  { %217 = vmatpush.msrb.mxu0 %v191_v8 }
  0x2d   :  { %278 = vmatpush.msrb.mxu2 %v230_v15  ;;  %338 = vmatmul.msk.f32.vlgmr.msrb.gmra.mxu1 %vm236_vm2, %v39_v32 }
  0x2e   :  { %218 = vmatpush.msrb.mxu0 %v190_v9  ;;  %321 = vmatpush.msrb.mxu3 %v298_v36 }
  0x2f   :  { %279 = vmatpush.msrb.mxu2 %v229_v16 }
  0x30   :  { %219 = vmatpush.msrb.mxu0 %v189_v10  ;;  %322 = vmatpush.msrb.mxu3 %v297_v41 }
  0x31   :  { %280 = vmatpush.msrb.mxu2 %v228_v17 }
  0x32   :  { %323 = vmatpush.msrb.mxu3 %v296_v42 }
  0x33   :  { %281 = vmatpush.msrb.mxu2 %v227_v28 }
  0x34   :  { %324 = vmatpush.msrb.mxu3 %v295_v43 }
  0x35   :  { %282 = vmatpush.msrb.mxu2 %v226_v29 }
  0x36   :  { %325 = vmatpush.msrb.mxu3 %v294_v44 }
  0x37   :  { %283 = vmatpush.msrb.mxu2 %v225_v31 }
  0xa0   :  { %v125_v19 = vpop.f32.mrf.mxu0 }
  0xa1   :  { %v126_v20 = vadd.f32 %v341_v18, %v125_v19 }
  0xa2   :  { %v145_v21 = vpop.f32.mrf.mxu1 }
  0xa3   :  { %v146_v22 = vadd.f32 %v145_v21, %v126_v20 }
  0xa5   :  { %v165_v23 = vpop.f32.mrf.mxu2 }
  0xa6   :  { %v166_v24 = vadd.f32 %v165_v23, %v146_v22  ;;  %v185_v25 = vpop.f32.mrf.mxu3 }
  0xa8   :  { %v186_v26 = vadd.f32 %v185_v25, %v166_v24 }
  0xaa   :  { %v188_v27 = vmax.f32 %v186_v26, 0.0  ;;  %v261_v45 = vpop.f32.mrf.mxu1 }
  0xac   :  { %336 = vmatmul.msk.f32.vlgmr.msrb.gmra.mxu0 %vm200_vm0, %v188_v27 }
 0x129   :  { %v221_v38 = vpop.f32.mrf.mxu0 }
 0x12a   :  { %v222_v39 = vadd.f32 %v342_v37, %v221_v38 }
 0x12c   :  { %v224_v40 = vmax.f32 %v222_v39, 0.0 }
 0x12e   :  { %339 = vmatmul.msk.f32.vlgmr.msrb.gmra.mxu2 %vm264_vm3, %v224_v40 }
 0x1b1   :  { %v285_v47 = vpop.f32.mrf.mxu2 }
 0x1b2   :  { %v286_v48 = vadd.f32 %v285_v47, %v261_v45 }
 0x1b4   :  { %v292_v49 = vadd.f32 %v343_v46, %v286_v48 }
 0x1b6   :  { %v293_v50 = vmax.f32 %v292_v49, 0.0 }
 0x1b8   :  { %340 = vmatmul.msk.f32.vlgmr.msrb.gmra.mxu3 %vm306_vm4, %v293_v50 }
 0x23b   :  { %v327_v52 = vpop.f32.mrf.mxu3 }
 0x23c   :  { %v328_v53 = vadd.f32 %v344_v51, %v327_v52 }
 0x23e   :  { %331 = vst.msk [vmem:[%s710_s10] sm:$0xff] %vm330_vm5, %v328_v53 }

</bundles_post_ra>
